<compile_context>
chip_gen: v5e
topology: v5e:2x2
jax: 0.10.0
libtpu: 0.0.40
codegen_flags: <defaults>
</compile_context>

<pallas_src>
import functools
import math

import jax
import jax.numpy as jnp
from jax import lax
from jax.experimental import pallas as pl
from jax.experimental.pallas import tpu as pltpu


def head_kernel(p_ref, x_ref, wqkv_ref, o_ref, *, mxu_dtype):
    # p_ref: (1,) f32 in SMEM; x_ref: (B, T, C); wqkv_ref: (C, 3H) = [Wq|Wk|Wv];
    # o_ref: (B, T, H).  Single invocation (no grid), everything in VMEM.
    H = o_ref.shape[-1]
    T = x_ref.shape[1]

    x = x_ref[...].astype(mxu_dtype)          # (B, T, C)
    w = wqkv_ref[...].astype(mxu_dtype)       # (C, 3H)

    # Fused QKV projection: one MXU pass over x, f32 accumulation.
    qkv = lax.dot_general(
        x, w,
        dimension_numbers=(((2,), (0,)), ((), ())),
        preferred_element_type=jnp.float32)   # (B, T, 3H) f32

    # scale = p^(-0.5) via rsqrt (EUP); fold it into q (T*H work, not T*T).
    scale = lax.rsqrt(p_ref[0])
    q = (qkv[:, :, :H] * scale).astype(mxu_dtype)
    k = qkv[:, :, H:2 * H].astype(mxu_dtype)
    v = qkv[:, :, 2 * H:].astype(mxu_dtype)

    # Attention scores: contract on H for both operands -> no k transpose.
    wei = lax.dot_general(
        q, k,
        dimension_numbers=(((2,), (2,)), ((0,), (0,))),
        preferred_element_type=jnp.float32)   # (B, T, T) f32

    # Causal mask (== tril[:T, :T]).  Large finite negative instead of -inf so
    # a fully-masked row could never produce NaN if this kernel is reused.
    row = lax.broadcasted_iota(jnp.int32, (T, T), 0)
    col = lax.broadcasted_iota(jnp.int32, (T, T), 1)
    wei = jnp.where(col <= row, wei, jnp.float32(-1e30))

    # Softmax along the last axis; f32 math (v5e has no bf16 VPU/EUP path).
    m = jnp.max(wei, axis=-1, keepdims=True)
    e = jnp.exp(wei - m)
    probs = e * pl.reciprocal(jnp.sum(e, axis=-1, keepdims=True), approx=True)

    # Weighted aggregation of values (deliberate cast of f32 probs for the MXU).
    out = lax.dot_general(
        probs.astype(mxu_dtype), v,
        dimension_numbers=(((2,), (1,)), ((0,), (0,))),
        preferred_element_type=jnp.float32)   # (B, T, H) f32

    o_ref[...] = out.astype(o_ref.dtype)


def head_forward(x, wq, wk, wv, p, *, mxu_dtype=jnp.float32):
    """Single-head causal self-attention (eval-mode dropout).

    x: (B, T, C); wq/wk/wv: (C, H) pre-transposed nn.Linear weights;
    p: (1,) learned scalar.  Returns (B, T, H).

    mxu_dtype=jnp.bfloat16 switches the matmul *operands* to bf16 with f32
    accumulation (v6e/v7x recommendation); softmax stays f32 on all chips.
    """
    B, T, C = x.shape
    H = wq.shape[1]
    # Host/XLA-side QKV weight fusion -> one weight tile + one projection matmul.
    w_qkv = jnp.concatenate([wq, wk, wv], axis=1)   # (C, 3H)

    kernel = functools.partial(head_kernel, mxu_dtype=mxu_dtype)
    return pl.pallas_call(
        kernel,
        out_shape=jax.ShapeDtypeStruct((B, T, H), x.dtype),
        # No grid: the whole problem fits a single block at module shapes, so
        # there is no per-grid-step pipeline overhead.
        in_specs=[
            pl.BlockSpec(memory_space=pltpu.SMEM),   # p (scalar parameter)
            pl.BlockSpec(memory_space=pltpu.VMEM),   # x, whole (B, T, C)
            pl.BlockSpec(memory_space=pltpu.VMEM),   # fused Wqkv (C, 3H)
        ],
        out_specs=pl.BlockSpec(memory_space=pltpu.VMEM),
    )(p, x, w_qkv)


def head_reference(x, wq, wk, wv, p):
    q = x @ wq
    k = x @ wk
    v = x @ wv
    wei = (q @ jnp.swapaxes(k, -2, -1)) * (p[0] ** (-0.5))
    T = x.shape[1]
    tril = jnp.tril(jnp.ones((T, T), dtype=bool))
    wei = jnp.where(tril, wei, -jnp.inf)
    wei = jax.nn.softmax(wei, axis=-1)
    return wei @ v


if __name__ == "__main__":
    # Shapes consistent with the module: batch=2, block_size (T)=8,
    # n_embd (C)=32, head_size (H)=16.
    B, T, C, H = 2, 8, 32, 16

    key = jax.random.PRNGKey(0)
    kx, kk, kq, kv = jax.random.split(key, 4)

    x = jax.random.normal(kx, (B, T, C), dtype=jnp.float32)

    # nn.Linear default init U(-1/sqrt(C), 1/sqrt(C)); stored as (C, H).
    bound = 1.0 / math.sqrt(C)
    wk = jax.random.uniform(kk, (C, H), jnp.float32, -bound, bound)
    wq = jax.random.uniform(kq, (C, H), jnp.float32, -bound, bound)
    wv = jax.random.uniform(kv, (C, H), jnp.float32, -bound, bound)
    p = jnp.ones((1,), dtype=jnp.float32)   # self.p = nn.Parameter(torch.ones([1]))

    ref = head_reference(x, wq, wk, wv, p)

    # f32 MXU operands.  Tolerance covers the EUP approximate reciprocal used
    # for the softmax normalization (pl.reciprocal(approx=True)).
    out = jax.block_until_ready(head_forward(x, wq, wk, wv, p))
    assert out.shape == (B, T, H)
    assert jnp.allclose(out, ref, atol=2e-3, rtol=2e-3), (
        "max abs err (f32 path): %e" % float(jnp.max(jnp.abs(out - ref))))

    # bf16 MXU operands with f32 accumulation (v6e/v7x fast path); loose
    # sanity tolerance appropriate for bf16 matmul operands.
    out_bf16 = jax.block_until_ready(
        head_forward(x, wq, wk, wv, p, mxu_dtype=jnp.bfloat16))
    assert out_bf16.shape == (B, T, H)
    assert jnp.allclose(out_bf16, ref, atol=1e-1, rtol=1e-1), (
        "max abs err (bf16 path): %e" % float(jnp.max(jnp.abs(out_bf16 - ref))))

    print("KERNEL_OK")
</pallas_src>

<mosaic_0001>
module attributes {stable_mosaic.version = 11 : i64} {
  func.func @head_kernel(%arg0: memref<1xf32, #tpu.memory_space<smem>>, %arg1: memref<2x8x32xf32, #tpu.memory_space<vmem>>, %arg2: memref<32x48xf32, #tpu.memory_space<vmem>>, %arg3: memref<2x8x16xf32, #tpu.memory_space<vmem>>) attributes {dimension_semantics = [], scalar_prefetch = 0 : i64, scratch_operands = 0 : i64, tpu.core_type = #tpu.core_type<tc>} {
    %c0 = arith.constant 0 : index
    %c0_0 = arith.constant 0 : index
    %c0_1 = arith.constant 0 : index
    %0 = vector.load %arg1[%c0, %c0_0, %c0_1] : memref<2x8x32xf32, #tpu.memory_space<vmem>>, vector<2x8x32xf32>
    %c0_2 = arith.constant 0 : index
    %c0_3 = arith.constant 0 : index
    %1 = vector.load %arg2[%c0_2, %c0_3] : memref<32x48xf32, #tpu.memory_space<vmem>>, vector<32x48xf32>
    %cst = arith.constant dense<0.000000e+00> : vector<2x8x48xf32>
    %2 = tpu.matmul %0, %1, %cst {dimension_numbers = #tpu.dot_dimension_numbers<[2], [0], [0, 1], [1], [0, 0, 0, 1, 1, 1], [], []>} : vector<2x8x32xf32>, vector<32x48xf32>, vector<2x8x48xf32> -> vector<2x8x48xf32>
    %c0_4 = arith.constant 0 : index
    %3 = memref.load %arg0[%c0_4] : memref<1xf32, #tpu.memory_space<smem>>
    %4 = math.rsqrt %3 : f32
    %5 = vector.extract_strided_slice %2 {offsets = [0, 0, 0], sizes = [2, 8, 16], strides = [1, 1, 1]} : vector<2x8x48xf32> to vector<2x8x16xf32>
    %6 = vector.broadcast %4 : f32 to vector<2x8x16xf32>
    %7 = arith.mulf %5, %6 : vector<2x8x16xf32>
    %8 = vector.extract_strided_slice %2 {offsets = [0, 0, 16], sizes = [2, 8, 16], strides = [1, 1, 1]} : vector<2x8x48xf32> to vector<2x8x16xf32>
    %9 = vector.extract_strided_slice %2 {offsets = [0, 0, 32], sizes = [2, 8, 16], strides = [1, 1, 1]} : vector<2x8x48xf32> to vector<2x8x16xf32>
    %cst_5 = arith.constant dense<0.000000e+00> : vector<2x8x8xf32>
    %10 = tpu.matmul %7, %8, %cst_5 {dimension_numbers = #tpu.dot_dimension_numbers<[2], [2], [1], [1], [0, 0, 0, 1, 1, 1], [0], [0]>} : vector<2x8x16xf32>, vector<2x8x16xf32>, vector<2x8x8xf32> -> vector<2x8x8xf32>
    %11 = tpu.iota {dimensions = array<i32: 0>} : vector<8x8xi32>
    %12 = tpu.iota {dimensions = array<i32: 1>} : vector<8x8xi32>
    %13 = arith.cmpi sle, %12, %11 : vector<8x8xi32>
    %cst_6 = arith.constant -1.000000e+30 : f32
    %14 = vector.shape_cast %13 : vector<8x8xi1> to vector<1x8x8xi1>
    %15 = vector.broadcast %14 : vector<1x8x8xi1> to vector<2x8x8xi1>
    %16 = vector.broadcast %cst_6 : f32 to vector<2x8x8xf32>
    %17 = arith.select %15, %10, %16 : vector<2x8x8xi1>, vector<2x8x8xf32>
    %cst_7 = arith.constant dense<0xFF800000> : vector<2x8xf32>
    %18 = vector.multi_reduction <maximumf>, %17, %cst_7 [2] : vector<2x8x8xf32> to vector<2x8xf32>
    %19 = vector.shape_cast %18 : vector<2x8xf32> to vector<2x8x1xf32>
    %20 = vector.broadcast %19 : vector<2x8x1xf32> to vector<2x8x8xf32>
    %21 = arith.subf %17, %20 : vector<2x8x8xf32>
    %22 = math.exp %21 : vector<2x8x8xf32>
    %cst_8 = arith.constant dense<0.000000e+00> : vector<2x8xf32>
    %23 = vector.multi_reduction <add>, %22, %cst_8 [2] : vector<2x8x8xf32> to vector<2x8xf32>
    %24 = vector.shape_cast %23 : vector<2x8xf32> to vector<2x8x1xf32>
    %25 = tpu.reciprocal %24 {approx = true} : vector<2x8x1xf32> -> vector<2x8x1xf32>
    %26 = vector.broadcast %25 : vector<2x8x1xf32> to vector<2x8x8xf32>
    %27 = arith.mulf %22, %26 : vector<2x8x8xf32>
    %cst_9 = arith.constant dense<0.000000e+00> : vector<2x8x16xf32>
    %28 = tpu.matmul %27, %9, %cst_9 {dimension_numbers = #tpu.dot_dimension_numbers<[2], [1], [1], [2], [0, 0, 0, 1, 1, 2], [0], [0]>} : vector<2x8x8xf32>, vector<2x8x16xf32>, vector<2x8x16xf32> -> vector<2x8x16xf32>
    %c0_10 = arith.constant 0 : index
    %c0_11 = arith.constant 0 : index
    %c0_12 = arith.constant 0 : index
    %29 = vector.load %arg3[%c0_10, %c0_11, %c0_12] : memref<2x8x16xf32, #tpu.memory_space<vmem>>, vector<2x8x16xf32>
    tpu.vector_store %arg3[%c0_10, %c0_11, %c0_12], %28 {strides = array<i32>} : memref<2x8x16xf32, #tpu.memory_space<vmem>>, vector<2x8x16xf32>,
    return
  }
}

</mosaic_0001>

<bundles_post_ra>
// kernel: tpu_custom_call.1
= control target key start
LH: loop header
LB: loop body
LE: loop exit
PB: predicated region body
PF: predicated region fallthrough
CT: control target
= control target key end

     0   :  { %9 = vsyncpa [#allocation4], 0  ;;  %s428_s0 = inlined_call_operand.<no memory space> [shape: f32[1], index: 0, kind: input, shape index: {}]   ;;  %s429_s1 = inlined_call_operand.hbm [shape: f32[2,8,32], index: 1, kind: input, shape index: {}]   ;;  %s430_s2 = inlined_call_operand.hbm [shape: f32[32,48], index: 2, kind: input, shape index: {}]   ;;  %s431_s3 = inlined_call_operand.hbm [shape: f32[2,8,16], index: 3, kind: output, shape index: {}]  }
   0x1   :  { %10 = vsyncpa [#allocation7], 0 }
   0x2   :  { %11 = vsyncpa [#allocation5], 0  ;;  %s18_s14 = sshll.u32 %s429_s1, 4  ;;  %s368_s15 = smov [#allocation3]   ;;  %s19_s14 = int_to_ptr.hbm [resolvable:$true] %s18_s14 }
   0x3   :  { %s20_s16 = sshll.u32 %s368_s15, 4  ;;  %s31_s19 = sshll.u32 %s430_s2, 4  ;;  %s21_s16 = int_to_ptr.vmem [resolvable:$true] %s20_s16  ;;  %s32_s19 = int_to_ptr.hbm [resolvable:$true] %s31_s19 }
   0x4   :  { %s369_s20 = smov 128   ;;  %s370_s21 = smov 8  }
   0x5   :  { %26 = dma.hbm_to_vmem [thread:$0]  %s19_s14, 256, %s21_s16, [#allocation4], %s369_s20, %s369_s20, %s370_s21  }
   0x6   :  { %s371_s22 = smov [#allocation6]  }
   0x7   :  { %s33_s23 = sshll.u32 %s371_s22, 4  ;;  %s34_s23 = int_to_ptr.vmem [resolvable:$true] %s33_s23 }
   0x8   :  { %39 = dma.hbm_to_vmem [thread:$0]  %s32_s19, 512, %s34_s23, [#allocation7], %s369_s20, %s369_s20, %s370_s21  }
   0x9   :  { %362 = dma.done.wait [#allocation4], 256  }
   0xa   :  { %363 = vsyncadd [#allocation4], 4294967040 }
   0xb   :  { %364 = dma.done.wait [#allocation7], 512  }
   0xc   :  { %365 = vsyncadd [#allocation7], 4294966784  ;;  %v85_v0 = vstv %s428_s0  ;;  %v53_v2 = vld [vmem:[#allocation6 + $0x18] sm:$0xff]  ;;  %v52_v3 = vld [vmem:[#allocation6 + $0x10] sm:$0xff]  ;;  %vm54_vm0 = vcmask 261120   ;;  %s372_s0 = smov 112   ;;  %v157_v22 = vlaneseq }
   0xd   :  { %280 = vrsqrt.f32 %v85_v0  ;;  %73 = vmatpush.msra.mxu0 %v53_v2  ;;  %v51_v5 = vld [vmem:[#allocation6 + $0x8] sm:$0xff]  ;;  %v50_v7 = vld [vmem:[#allocation6] sm:$0xff]  ;;  %v48_v8 = vld [vmem:[#allocation3] sm:$0xff]  ;;  %vm92_vm1 = vweird.f32 %v85_v0  ;;  %s373_s24 = smov 96   ;;  %vm103_vm4 = vcmask 130048   ;;  %vm166_vm6 = vcmask 64512  }
   0xe   :  { %v49_v13 = vld [vmem:[#allocation3 + $0x8] sm:$0xff]  ;;  %v158_v23 = vshrl.u32 %v157_v22, 7  ;;  %v160_v24 = vand.u32 127, %v157_v22  ;;  %s374_s26 = smov [#allocation8]   ;;  %s249_s30 = sshll.u32 %s431_s3, 4  ;;  %s250_s30 = int_to_ptr.hbm [resolvable:$true] %s249_s30 }
   0xf   :  { %74 = vmatpush.msra.mxu0 %v52_v3  ;;  %s247_s27 = sshll.u32 %s374_s26, 4  ;;  %s248_s27 = int_to_ptr.vmem [resolvable:$true] %s247_s27 }
  0x10   :  { %vm161_vm5 = vcmp.le.s32.totalorder %v160_v24, %v158_v23 }
  0x11   :  { %75 = vmatpush.msra.mxu0 %v51_v5 }
  0x13   :  { %v281_v1 = vpop.eup %280  ;;  %76 = vmatpush.msra.mxu0 %v50_v7 }
  0x14   :  { %v87_v4 = vmul.f32 %v281_v1, %v85_v0  ;;  %vm93_vm2 = vweird.f32 %v281_v1  ;;  %263 = vmatmul.msk.f32.vlgmr.msra.gmra.mxu0 %vm54_vm0, %v48_v8 }
  0x15   :  { %vm94_vm3 = vmor %vm92_vm1, %vm93_vm2 }
  0x16   :  { %v88_v6 = vmul.f32 %v281_v1, %v87_v4 }
  0x18   :  { %v89_v9 = vmul.f32 0.5, %v88_v6 }
  0x1a   :  { %v90_v10 = vsub.f32 1.5, %v89_v9 }
  0x1c   :  { %v91_v11 = vmul.f32 %v281_v1, %v90_v10  ;;  %264 = vmatmul.msk.f32.gmra.mxu0 %vm54_vm0, %v49_v13 }
  0x1e   :  { %v95_v12 = vsel %vm94_vm3, %v281_v1, %v91_v11 }
  0x1f   :  { %271 = vpush %v95_v12 }
  0x50   :  { %s272_s25 = spop %271 }
  0x51   :  { %v97_v16 = vstv %s272_s25 }
  0x91   :  { %v78_v14 = vpop.f32.mrf.mxu0 }
  0x92   :  { %101 = vrot.lane.b32.xlu0 %v78_v14, %s372_s0  ;;  %v98_v18 = vmul.f32 %v97_v16, %v78_v14 }
  0x99   :  { %v81_v15 = vpop.f32.mrf.mxu0 }
  0x9a   :  { %130 = vrot.lane.b32.xlu0 %v81_v15, %s372_s0  ;;  %v99_v20 = vmul.f32 %v97_v16, %v81_v15 }
  0xa2   :  { %189 = vrot.lane.b32.xlu0 %v78_v14, %s373_s24 }
 0x104   :  { %v102_v17 = vpop.permute.xlu0 %101 }
 0x105   :  { %265 = vmatpush.xpose.msk.msra.mxu1 %vm103_vm4, %v102_v17 }
 0x108   :  { %266 = vmatmul.msk.f32.vlgmr.msra.gmra.mxu1 %vm103_vm4, %v98_v18 }
 0x10c   :  { %v131_v19 = vpop.permute.xlu0 %130 }
 0x10d   :  { %267 = vmatpush.xpose.msk.msra.mxu2 %vm103_vm4, %v131_v19 }
 0x110   :  { %268 = vmatmul.msk.f32.vlgmr.msra.gmra.mxu2 %vm103_vm4, %v99_v20 }
 0x114   :  { %v190_v21 = vpop.permute.xlu0 %189 }
 0x115   :  { %210 = vmatpush.msra.mxu3 %v190_v21 }
 0x185   :  { %v126_v25 = vpop.f32.mrf.mxu1 }
 0x186   :  { %v164_v26 = vsel %vm161_vm5, %v126_v25, -1e+30 }
 0x187   :  { %v167_v27 = vsel %vm166_vm6, %v164_v26, -inf }
 0x188   :  { %168 = vmax.xlane.f32.xlu1 %v167_v27 }
 0x193   :  { %v154_v28 = vpop.f32.mrf.mxu2 }
 0x194   :  { %v165_v29 = vsel %vm161_vm5, %v154_v28, -1e+30 }
 0x195   :  { %v170_v30 = vsel %vm166_vm6, %v165_v29, -inf }
 0x196   :  { %171 = vmax.xlane.f32.xlu1 %v170_v30 }
 0x1af   :  { %215 = vrot.lane.b32.xlu1 %v81_v15, %s373_s24 }
 0x1fb   :  { %v169_v31 = vpop.xlane.xlu1 %168 }
 0x1fc   :  { %v173_v32 = vsub.f32 %v164_v26, %v169_v31 }
 0x1fe   :  { %v175_v33 = vmul.f32 1.442695, %v173_v32 }
 0x200   :  { %282 = vpow2.f32 %v175_v33 }
 0x206   :  { %v283_v34 = vpop.eup %282 }
 0x207   :  { %v179_v35 = vsel %vm166_vm6, %v283_v34, 0.0 }
 0x208   :  { %180 = vadd.xlane.f32.xlu2 %v179_v35 }
 0x209   :  { %v172_v36 = vpop.xlane.xlu1 %171 }
 0x20a   :  { %v174_v37 = vsub.f32 %v165_v29, %v172_v36 }
 0x20c   :  { %v177_v38 = vmul.f32 1.442695, %v174_v37 }
 0x20e   :  { %284 = vpow2.f32 %v177_v38 }
 0x214   :  { %v285_v39 = vpop.eup %284 }
 0x215   :  { %v182_v40 = vsel %vm166_vm6, %v285_v39, 0.0 }
 0x216   :  { %183 = vadd.xlane.f32.xlu2 %v182_v40 }
 0x221   :  { %v216_v41 = vpop.permute.xlu1 %215 }
 0x222   :  { %236 = vmatpush.msrb.mxu3 %v216_v41 }
 0x27b   :  { %v181_v42 = vpop.xlane.xlu2 %180 }
 0x27c   :  { %286 = vrcp.f32 %v181_v42 }
 0x282   :  { %v287_v43 = vpop.eup %286 }
 0x283   :  { %v187_v44 = vmul.f32 %v287_v43, %v283_v34 }
 0x285   :  { %269 = vmatmul.msk.f32.vlgmr.msra.gmra.mxu3 %vm166_vm6, %v187_v44 }
 0x289   :  { %v184_v45 = vpop.xlane.xlu2 %183 }
 0x28a   :  { %288 = vrcp.f32 %v184_v45 }
 0x290   :  { %v289_v46 = vpop.eup %288 }
 0x291   :  { %v188_v47 = vmul.f32 %v289_v46, %v285_v39 }
 0x293   :  { %270 = vmatmul.msk.f32.vlgmr.msrb.gmra.mxu3 %vm166_vm6, %v188_v47 }
 0x308   :  { %v212_v48 = vpop.f32.mrf.mxu3 }
 0x309   :  { %241 = vst.msk [vmem:[#allocation8] sm:$0xff] %vm103_vm4, %v212_v48 }
 0x316   :  { %v238_v49 = vpop.f32.mrf.mxu3 }
 0x317   :  { %242 = vst.msk [vmem:[#allocation8 + $0x8] sm:$0xff] %vm103_vm4, %v238_v49 }
 0x318   :  { %255 = dma.vmem_to_hbm [thread:$0]  %s248_s27, 256, %s250_s30, [#allocation5], %s369_s20, %s369_s20, %s370_s21  }
 0x319   :  { %366 = dma.done.wait [#allocation5], 256  }
 0x31a   :  { %367 = vsyncadd [#allocation5], 4294967040 }
 0x31b   :  { %260 = vsyncpa [#allocation4], 1 }
 0x31c   :  { %261 = vsyncpa [#allocation7], 1 }
 0x31d   :  { %262 = vsyncpa [#allocation5], 1 }

</bundles_post_ra>
